<compile_context>
chip_gen: v5e
topology: v5e:2x2
jax: 0.10.0
libtpu: 0.0.40
codegen_flags: <defaults>
</compile_context>

<pallas_src>
import functools

import jax
import jax.numpy as jnp
from jax.experimental import pallas as pl
from jax.experimental.pallas import tpu as pltpu

SUBLANE = 8
DEFAULT_TILE_B = 1024  # big enough to amortize ~0.35us/grid-step; VMEM cost is tiny


def qvalue_kernel(x_ref, w1_ref, b1_ref, w2_ref, b2_ref, out_ref):
    """One batch tile of fc1 -> ReLU -> fc2.  Weights arrive pre-cast to bf16."""
    # fc1: bf16 MXU operands, f32 accumulation.  (astype is a no-op if x is bf16.)
    x = x_ref[...].astype(jnp.bfloat16)
    h = jnp.dot(x, w1_ref[...], preferred_element_type=jnp.float32)
    # bias + ReLU in f32 on the VPU.
    h = jnp.maximum(h + b1_ref[...], 0.0)
    # fc2: bf16 operands, f32 accumulation.
    y = jnp.dot(h.astype(jnp.bfloat16), w2_ref[...],
                preferred_element_type=jnp.float32)
    out_ref[...] = (y + b2_ref[...]).astype(out_ref.dtype)


def _choose_tile_b(batch):
    """Pick the batch tile.

    - Modest batch: one grid step (whole problem fits VMEM trivially; tiling would
      only add per-step overhead, especially on single-TC v5e/v6e).
    - Large batch: ~DEFAULT_TILE_B rows per step (>= 2 steps, so the 'parallel'
      batch axis can shard across v7x's two TensorCores), preferring a tile that
      divides the 8-aligned batch so the wrapper never materializes a padded copy.
    """
    b_eff = max(SUBLANE, pl.cdiv(batch, SUBLANE) * SUBLANE)
    if b_eff <= DEFAULT_TILE_B:
        return b_eff
    for t in range(DEFAULT_TILE_B, DEFAULT_TILE_B // 2 - 1, -SUBLANE):
        if b_eff % t == 0:
            return t
    return DEFAULT_TILE_B


@functools.partial(jax.jit, static_argnames=("tile_b",))
def _qvalue_pallas(x, w1, b1, w2, b2, *, tile_b):
    B, state_dim = x.shape
    hidden_dim = w1.shape[1]
    action_dim = w2.shape[1]

    # Batch: pad (only if needed) to a multiple of tile_b so every step is full.
    num_tiles = pl.cdiv(B, tile_b)
    b_pad = num_tiles * tile_b
    if b_pad != B:
        x = jnp.pad(x, ((0, b_pad - B), (0, 0)))

    # Cost hint for the XLA scheduler (kernel is HBM-bandwidth bound).
    flops = 2 * b_pad * (state_dim * hidden_dim + hidden_dim * action_dim)
    bytes_accessed = (
        x.size * x.dtype.itemsize
        + w1.size * w1.dtype.itemsize + b1.size * b1.dtype.itemsize
        + w2.size * w2.dtype.itemsize + b2.size * b2.dtype.itemsize
        + b_pad * action_dim * 4
    )

    out = pl.pallas_call(
        qvalue_kernel,
        out_shape=jax.ShapeDtypeStruct((b_pad, action_dim), jnp.float32),
        grid_spec=pl.GridSpec(
            grid=(num_tiles,),
            in_specs=[
                # x: tiled along the batch axis, software-pipelined per grid step.
                pl.BlockSpec((tile_b, state_dim), lambda i: (i, 0)),
                # weights/biases: constant index_map -> VMEM-resident across steps.
                pl.BlockSpec(w1.shape, lambda i: (0, 0)),
                pl.BlockSpec(b1.shape, lambda i: (0, 0)),
                pl.BlockSpec(w2.shape, lambda i: (0, 0)),
                pl.BlockSpec(b2.shape, lambda i: (0, 0)),
            ],
            # Output: narrow (action_dim) last dim == full array dim -> legal block,
            # and ~16x less HBM writeback than a 128-lane-padded slab.
            out_specs=pl.BlockSpec((tile_b, action_dim), lambda i: (i, 0)),
        ),
        compiler_params=pltpu.CompilerParams(
            # Batch tiles are independent -> parallel (v7x: shard across 2 TCs).
            dimension_semantics=("parallel",),
        ),
        cost_estimate=pl.CostEstimate(
            flops=flops, transcendentals=0, bytes_accessed=bytes_accessed
        ),
    )(x, w1, b1, w2, b2)

    return out[:B] if b_pad != B else out


def qvalue_net(x, w1, b1, w2, b2, *, tile_b=None):
    """Forward pass of QValueNet via one batch-tiled pallas_call.

    w1/w2 should ideally be stored in bf16 by the caller; if they arrive f32 they
    are cast once here (not per grid step inside the kernel).
    """
    if tile_b is None:
        tile_b = _choose_tile_b(x.shape[0])
    if w1.dtype != jnp.bfloat16:
        w1 = w1.astype(jnp.bfloat16)
    if w2.dtype != jnp.bfloat16:
        w2 = w2.astype(jnp.bfloat16)
    return _qvalue_pallas(x, w1, b1, w2, b2, tile_b=tile_b)


def init_params(key, state_dim, hidden_dim, action_dim):
    """Deterministic init mimicking PyTorch Linear default: U(-1/sqrt(fan_in), ...)."""
    k1, k2, k3, k4 = jax.random.split(key, 4)
    bound1 = 1.0 / jnp.sqrt(state_dim)
    bound2 = 1.0 / jnp.sqrt(hidden_dim)
    # Stored as [in, out] (transposed vs torch's [out, in]) so the kernel does x @ W.
    w1 = jax.random.uniform(k1, (state_dim, hidden_dim), jnp.float32, -bound1, bound1)
    b1 = jax.random.uniform(k2, (1, hidden_dim), jnp.float32, -bound1, bound1)
    w2 = jax.random.uniform(k3, (hidden_dim, action_dim), jnp.float32, -bound2, bound2)
    b2 = jax.random.uniform(k4, (1, action_dim), jnp.float32, -bound2, bound2)
    return w1, b1, w2, b2


if __name__ == "__main__":
    batch = 2
    state_dim = 16
    hidden_dim = 32
    action_dim = 8

    key = jax.random.PRNGKey(0)
    kx, kp = jax.random.split(key)
    x = jax.random.normal(kx, (batch, state_dim), jnp.float32)
    w1, b1, w2, b2 = init_params(kp, state_dim, hidden_dim, action_dim)

    out = qvalue_net(x, w1, b1, w2, b2)
    out = jax.block_until_ready(out)

    # Reference check against plain f32 JAX (same math as the PyTorch forward).
    # Tolerance relaxed because the kernel uses bf16 MXU operands (f32 accumulation).
    ref = jnp.maximum(x @ w1 + b1, 0.0) @ w2 + b2
    assert out.shape == (batch, action_dim), out.shape
    assert jnp.allclose(out, ref, atol=5e-2, rtol=5e-2), jnp.max(jnp.abs(out - ref))

    # TODO(synk): for real SAC workloads, fuse target-network forward + TD-error
    # epilogue into this pallas_call so the (small) activations never round-trip HBM.

    print("KERNEL_OK")
</pallas_src>

<mosaic_0001>
module attributes {stable_mosaic.version = 11 : i64} {
  func.func @qvalue_kernel(%arg0: i32, %arg1: memref<8x16xf32, #tpu.memory_space<vmem>>, %arg2: memref<16x32xbf16, #tpu.memory_space<vmem>>, %arg3: memref<1x32xf32, #tpu.memory_space<vmem>>, %arg4: memref<32x8xbf16, #tpu.memory_space<vmem>>, %arg5: memref<1x8xf32, #tpu.memory_space<vmem>>, %arg6: memref<8x8xf32, #tpu.memory_space<vmem>>) attributes {dimension_semantics = [#tpu.dimension_semantics<parallel>], iteration_bounds = array<i64: 1>, scalar_prefetch = 0 : i64, scratch_operands = 0 : i64, tpu.core_type = #tpu.core_type<tc>, window_params = [{transform_indices = @transform_0, window_bounds = array<i64: 8, 16>}, {pipeline_mode = #tpu.pipeline_mode<synchronous>, transform_indices = @transform_1, window_bounds = array<i64: 16, 32>}, {pipeline_mode = #tpu.pipeline_mode<synchronous>, transform_indices = @transform_2, window_bounds = array<i64: 1, 32>}, {pipeline_mode = #tpu.pipeline_mode<synchronous>, transform_indices = @transform_3, window_bounds = array<i64: 32, 8>}, {pipeline_mode = #tpu.pipeline_mode<synchronous>, transform_indices = @transform_4, window_bounds = array<i64: 1, 8>}, {transform_indices = @transform_5, window_bounds = array<i64: 8, 8>}]} {
    %c0 = arith.constant 0 : index
    %c0_0 = arith.constant 0 : index
    %0 = vector.load %arg1[%c0, %c0_0] : memref<8x16xf32, #tpu.memory_space<vmem>>, vector<8x16xf32>
    %1 = arith.truncf %0 : vector<8x16xf32> to vector<8x16xbf16>
    %c0_1 = arith.constant 0 : index
    %c0_2 = arith.constant 0 : index
    %2 = vector.load %arg2[%c0_1, %c0_2] : memref<16x32xbf16, #tpu.memory_space<vmem>>, vector<16x32xbf16>
    %cst = arith.constant dense<0.000000e+00> : vector<8x32xf32>
    %3 = tpu.matmul %1, %2, %cst {dimension_numbers = #tpu.dot_dimension_numbers<[1], [0], [0], [1], [0, 0, 1, 1], [], []>} : vector<8x16xbf16>, vector<16x32xbf16>, vector<8x32xf32> -> vector<8x32xf32>
    %c0_3 = arith.constant 0 : index
    %c0_4 = arith.constant 0 : index
    %4 = vector.load %arg3[%c0_3, %c0_4] : memref<1x32xf32, #tpu.memory_space<vmem>>, vector<1x32xf32>
    %5 = vector.broadcast %4 : vector<1x32xf32> to vector<8x32xf32>
    %6 = arith.addf %3, %5 : vector<8x32xf32>
    %cst_5 = arith.constant 0.000000e+00 : f32
    %7 = vector.broadcast %cst_5 : f32 to vector<8x32xf32>
    %8 = arith.maximumf %6, %7 : vector<8x32xf32>
    %9 = arith.truncf %8 : vector<8x32xf32> to vector<8x32xbf16>
    %c0_6 = arith.constant 0 : index
    %c0_7 = arith.constant 0 : index
    %10 = vector.load %arg4[%c0_6, %c0_7] : memref<32x8xbf16, #tpu.memory_space<vmem>>, vector<32x8xbf16>
    %cst_8 = arith.constant dense<0.000000e+00> : vector<8x8xf32>
    %11 = tpu.matmul %9, %10, %cst_8 {dimension_numbers = #tpu.dot_dimension_numbers<[1], [0], [0], [1], [0, 0, 1, 1], [], []>} : vector<8x32xbf16>, vector<32x8xbf16>, vector<8x8xf32> -> vector<8x8xf32>
    %c0_9 = arith.constant 0 : index
    %c0_10 = arith.constant 0 : index
    %12 = vector.load %arg5[%c0_9, %c0_10] : memref<1x8xf32, #tpu.memory_space<vmem>>, vector<1x8xf32>
    %13 = vector.broadcast %12 : vector<1x8xf32> to vector<8x8xf32>
    %14 = arith.addf %11, %13 : vector<8x8xf32>
    %c0_11 = arith.constant 0 : index
    %c0_12 = arith.constant 0 : index
    %15 = vector.load %arg6[%c0_11, %c0_12] : memref<8x8xf32, #tpu.memory_space<vmem>>, vector<8x8xf32>
    tpu.vector_store %arg6[%c0_11, %c0_12], %14 {strides = array<i32>} : memref<8x8xf32, #tpu.memory_space<vmem>>, vector<8x8xf32>,
    return
  }
  func.func @transform_0(%arg0: i32) -> (i32, i32) {
    %c0_i32 = arith.constant 0 : i32
    %c0_i32_0 = arith.constant 0 : i32
    return %arg0, %c0_i32 : i32, i32
  }
  func.func @transform_1(%arg0: i32) -> (i32, i32) {
    %c0_i32 = arith.constant 0 : i32
    %c0_i32_0 = arith.constant 0 : i32
    %c0_i32_1 = arith.constant 0 : i32
    return %c0_i32, %c0_i32_0 : i32, i32
  }
  func.func @transform_2(%arg0: i32) -> (i32, i32) {
    %c0_i32 = arith.constant 0 : i32
    %c0_i32_0 = arith.constant 0 : i32
    %c0_i32_1 = arith.constant 0 : i32
    return %c0_i32, %c0_i32_0 : i32, i32
  }
  func.func @transform_3(%arg0: i32) -> (i32, i32) {
    %c0_i32 = arith.constant 0 : i32
    %c0_i32_0 = arith.constant 0 : i32
    %c0_i32_1 = arith.constant 0 : i32
    return %c0_i32, %c0_i32_0 : i32, i32
  }
  func.func @transform_4(%arg0: i32) -> (i32, i32) {
    %c0_i32 = arith.constant 0 : i32
    %c0_i32_0 = arith.constant 0 : i32
    %c0_i32_1 = arith.constant 0 : i32
    return %c0_i32, %c0_i32_0 : i32, i32
  }
  func.func @transform_5(%arg0: i32) -> (i32, i32) {
    %c0_i32 = arith.constant 0 : i32
    %c0_i32_0 = arith.constant 0 : i32
    return %arg0, %c0_i32 : i32, i32
  }
}

</mosaic_0001>

<bundles_post_ra>
// kernel: _qvalue_pallas.1
= control target key start
LH: loop header
LB: loop body
LE: loop exit
PB: predicated region body
PF: predicated region fallthrough
CT: control target
= control target key end

     0   :  { %vm35_vm0 = vcmask 130048   ;;  %vm74_vm1 = vcmask 261120   ;;  %vm91_vm2 = vcmask 64512   ;;  %s167_s1 = inlined_call_operand.vmem [shape: bf16[16,32], index: 1, kind: input, shape index: {}]   ;;  %s168_s0 = inlined_call_operand.vmem [shape: f32[8,16], index: 0, kind: input, shape index: {}]   ;;  %s169_s2 = inlined_call_operand.vmem [shape: f32[1,32], index: 2, kind: input, shape index: {}]   ;;  %s170_s4 = inlined_call_operand.vmem [shape: f32[1,8], index: 4, kind: input, shape index: {}]   ;;  %s171_s3 = inlined_call_operand.vmem [shape: bf16[32,8], index: 3, kind: input, shape index: {}]   ;;  %s172_s5 = inlined_call_operand.vmem [shape: f32[8,8], index: 5, kind: output, shape index: {}]  }
   0x1   :  { %v111_v0 = vld [vmem:[%s167_s1] sm:$0xff]  ;;  %v113_v3 = vld [vmem:[%s171_s3 + $0x8] sm:$0xff] }
   0x2   :  { %v21_v1 = vld [vmem:[%s168_s0] sm:$0xff]  ;;  %46 = vmatpush.bf16.msra.mxu0 %v111_v0  ;;  %84 = vmatpush.bf16.msra.mxu1 %v113_v3 }
   0x3   :  { %v22_v2 = vpack.c.bf16 %v21_v1, %v21_v1  ;;  %v112_v4 = vld [vmem:[%s171_s3] sm:$0xff] }
   0x4   :  { %v114_v5 = vld [vmem:[%s169_s2] ss:$0 sm:$0xff] }
   0x5   :  { %101 = vmatmul.msk.bf16.vlgmr.msra.gmra.mxu0 %vm35_vm0, %v22_v2  ;;  %v115_v11 = vld [vmem:[%s170_s4] ss:$0 sm:$0xff] }
   0x6   :  { %85 = vmatpush.bf16.msra.mxu1 %v112_v4 }
  0x82   :  { %v48_v6 = vpop.f32.mrf.mxu0 }
  0x83   :  { %v49_v7 = vadd.f32 %v114_v5, %v48_v6 }
  0x85   :  { %v52_v8 = vmax.f32 %v49_v7, 0.0 }
  0x87   :  { %v53_v9 = vpack.c.bf16 %v52_v8, %v52_v8 }
  0x89   :  { %110 = vmatmul.msk.bf16.vlgmr.msra.gmra.mxu1 %vm74_vm1, %v53_v9 }
  0x8a   :  { %v50_v10 = vpop.f32.mrf.mxu0 }
 0x106   :  { %v87_v12 = vpop.f32.mrf.mxu1 }
 0x107   :  { %v88_v13 = vadd.f32 %v115_v11, %v87_v12 }
 0x109   :  { %92 = vst.msk [vmem:[%s172_s5] sm:$0xff] %vm91_vm2, %v88_v13 }
 0x10e   :  { %v89_v14 = vpop.f32.mrf.mxu1 }

</bundles_post_ra>
